<compile_context>
chip_gen: v6e
topology: v6e:2x2x1
jax: 0.10.0
libtpu: 0.0.40
codegen_flags: <defaults>
</compile_context>

<pallas_src>
import functools

import jax
import jax.numpy as jnp
from jax import lax
from jax.experimental import pallas as pl
from jax.experimental.pallas import tpu as pltpu


def _round_up(n: int, m: int) -> int:
    return ((n + m - 1) // m) * m


def _vmem_capacity_bytes() -> int:
    try:
        return int(pltpu.get_tpu_info().vmem_capacity_bytes)
    except Exception:
        return 64 * 1024 * 1024   # conservative fallback (v7x per-TC VMEM)


# ---------------------------------------------------------------------------
# Kernel A: whole weight stack resident in VMEM, layers unrolled in-kernel.
# Grid = (num_row_tiles,), "parallel".
# ---------------------------------------------------------------------------
def _mlp_resident_kernel(x_ref, w_ref, b_ref, o_ref, *, depth, compute_dtype):
    h0 = x_ref[...].astype(jnp.float32)            # [tm, Hp] f32 carry

    def layer(d, h):
        w = w_ref[d]                               # [Hp, Hp] (in, out) layout
        y = jnp.dot(h.astype(compute_dtype), w,
                    preferred_element_type=jnp.float32)
        return jnp.maximum(y + b_ref[d], 0.0)      # bias + ReLU in f32

    h = lax.fori_loop(0, depth, layer, h0, unroll=True)
    o_ref[...] = h.astype(o_ref.dtype)


# ---------------------------------------------------------------------------
# Kernel B: one layer's weights streamed per grid step; o_ref is the resident
# f32 carry across the innermost ("arbitrary") depth axis.  Bias stack is
# resident and indexed with the depth program id.
# Grid = (num_row_tiles, depth), ("parallel", "arbitrary").
# ---------------------------------------------------------------------------
def _mlp_streamed_kernel(x_ref, w_ref, b_ref, o_ref, *, compute_dtype):
    d = pl.program_id(1)

    @pl.when(d == 0)
    def _():
        o_ref[...] = x_ref[...].astype(o_ref.dtype)   # init carry per row tile

    h = o_ref[...].astype(compute_dtype)           # [tm, Hp]
    y = jnp.dot(h, w_ref[...], preferred_element_type=jnp.float32) + b_ref[d]
    o_ref[...] = jnp.maximum(y, 0.0).astype(o_ref.dtype)


def prepare_mlp_params(weights, biases, *, compute_dtype=jnp.bfloat16):
    """One-time weight prep (hoisted out of the per-call path).

    Transposes PyTorch nn.Linear (out, in) weights to (in, out) so the kernel
    computes ``h @ W`` with no in-kernel transpose, lane-pads hidden to a
    multiple of 128 (zero padding is exact for Linear + ReLU) and casts
    weights to the MXU operand dtype.  Biases stay f32.

    Returns:
        (w_t, b_p): [depth, Hp, Hp] compute_dtype, [depth, 1, Hp] f32.
    """
    depth, H, H2 = weights.shape
    assert H == H2
    Hp = max(_round_up(H, 128), 128)
    w_t = jnp.transpose(weights, (0, 2, 1))
    w_t = jnp.pad(w_t, ((0, 0), (0, Hp - H), (0, Hp - H))).astype(compute_dtype)
    b_p = jnp.pad(biases.astype(jnp.float32), ((0, 0), (0, Hp - H)))
    return w_t, b_p.reshape(depth, 1, Hp)


def mlp_block(x, w_t, b_p, *, tile_rows=None, layers_resident=None):
    """Applies depth x (Linear + ReLU) with prepared params.

    Args:
        x:    [rows, hidden] float32.
        w_t:  [depth, Hp, Hp] prepared weights (see prepare_mlp_params); dtype
              is the MXU operand dtype (bf16 recommended).
        b_p:  [depth, 1, Hp] float32 prepared biases.
        tile_rows: row-tile size (multiple of 8); None = generation-aware auto.
        layers_resident: force weight-resident (True) / streamed (False) path;
              None = auto by VMEM footprint.
    Returns:
        [rows, hidden] array with x.dtype.
    """
    M, H = x.shape
    depth, Hp, _ = w_t.shape
    assert H <= Hp and b_p.shape == (depth, 1, Hp)
    compute_dtype = w_t.dtype
    w_bytes = jnp.dtype(compute_dtype).itemsize

    vmem_cap = _vmem_capacity_bytes()
    budget = int(0.70 * vmem_cap)

    if tile_rows is None:
        # Streamed arithmetic intensity = tile_rows MACs per weight element;
        # ~700+ rows clears the HBM roofline on v6e, ~768 on v7x; larger is
        # harmless when VMEM allows it (v5e only needs ~256).
        tile_rows = 1024 if vmem_cap >= 96 * 2**20 else 768
    tile_rows = max(8, _round_up(tile_rows, 8))

    # Streamed-path footprint: 2x double-buffered f32 (x + out) tiles, one
    # double-buffered per-layer weight block, resident (2x-counted) bias stack.
    fixed_streamed = 2 * Hp * Hp * w_bytes + 2 * depth * Hp * 4
    per_row = 4 * Hp * 4
    if budget > fixed_streamed + 8 * per_row:
        max_tm = max(8, ((budget - fixed_streamed) // per_row) // 8 * 8)
    else:
        # TODO(synk): N-tile the weight output-feature axis for hidden sizes
        # whose per-layer weight block alone exhausts the VMEM budget.
        max_tm = 8
    tile_rows = min(tile_rows, max_tm)

    tm = min(_round_up(M, 8), tile_rows)
    if M > 8:
        # Guarantee >=2 row tiles so "parallel" shards across both v7x TCs.
        tm = min(tm, max(8, _round_up((M + 1) // 2, 8)))
    Mp = _round_up(M, tm)
    n_row_tiles = Mp // tm

    # Footprints including the pipeline's 2x buffering of constant-index blocks.
    resident_need = (2 * depth * Hp * Hp * w_bytes + 2 * depth * Hp * 4
                     + 4 * tm * Hp * 4)
    streamed_need = fixed_streamed + per_row * tm
    if layers_resident is None:
        layers_resident = resident_need <= budget
    need = resident_need if layers_resident else streamed_need
    vmem_limit = int(min(0.9 * vmem_cap, max(need + (16 << 20), 32 << 20)))
    vmem_limit = max(vmem_limit, need + (2 << 20))

    # Per-call work: only pad x (weights were prepared once).
    x_p = jnp.pad(x.astype(jnp.float32), ((0, Mp - M), (0, Hp - H)))

    if layers_resident:
        kernel = functools.partial(_mlp_resident_kernel,
                                   depth=depth, compute_dtype=compute_dtype)
        out = pl.pallas_call(
            kernel,
            out_shape=jax.ShapeDtypeStruct((Mp, Hp), jnp.float32),
            grid_spec=pltpu.PrefetchScalarGridSpec(
                num_scalar_prefetch=0,
                grid=(n_row_tiles,),
                in_specs=[
                    pl.BlockSpec((tm, Hp), lambda i: (i, 0)),            # x tile
                    pl.BlockSpec((depth, Hp, Hp), lambda i: (0, 0, 0)),  # all W
                    pl.BlockSpec((depth, 1, Hp), lambda i: (0, 0, 0)),   # all b
                ],
                out_specs=pl.BlockSpec((tm, Hp), lambda i: (i, 0)),
            ),
            input_output_aliases={0: 0},       # x_p buffer reused for output
            compiler_params=pltpu.CompilerParams(
                dimension_semantics=("parallel",),
                vmem_limit_bytes=vmem_limit,
            ),
        )(x_p, w_t, b_p)
    else:
        kernel = functools.partial(_mlp_streamed_kernel,
                                   compute_dtype=compute_dtype)
        out = pl.pallas_call(
            kernel,
            out_shape=jax.ShapeDtypeStruct((Mp, Hp), jnp.float32),
            grid_spec=pltpu.PrefetchScalarGridSpec(
                num_scalar_prefetch=0,
                grid=(n_row_tiles, depth),         # depth innermost: carry
                in_specs=[
                    pl.BlockSpec((tm, Hp), lambda i, d: (i, 0)),           # x
                    pl.BlockSpec((pl.Squeezed(), Hp, Hp),
                                 lambda i, d: (d, 0, 0)),                  # W[d]
                    pl.BlockSpec((depth, 1, Hp), lambda i, d: (0, 0, 0)),  # all b
                ],
                out_specs=pl.BlockSpec((tm, Hp), lambda i, d: (i, 0)),
            ),
            input_output_aliases={0: 0},
            compiler_params=pltpu.CompilerParams(
                dimension_semantics=("parallel", "arbitrary"),
                vmem_limit_bytes=vmem_limit,
            ),
        )(x_p, w_t, b_p)

    return out[:M, :H].astype(x.dtype)


def _ref_mlp_block(x, weights, biases, compute_dtype=jnp.float32):
    """Plain-JAX reference of the PyTorch forward pass (optionally mimicking
    the kernel's bf16 MXU operands with f32 accumulation/carry)."""
    h = x.astype(jnp.float32)
    for d in range(weights.shape[0]):
        w = weights[d].T.astype(compute_dtype)
        y = jnp.dot(h.astype(compute_dtype), w,
                    preferred_element_type=jnp.float32)
        h = jnp.maximum(y + biases[d].astype(jnp.float32), 0.0)
    return h.astype(x.dtype)


if __name__ == "__main__":
    hidden_size = 32
    depth = 3
    batch, seq = 2, 8

    key = jax.random.PRNGKey(0)
    kx, kw, kb = jax.random.split(key, 3)

    # nn.Linear-style init: U(-1/sqrt(in), 1/sqrt(in)).
    bound = 1.0 / jnp.sqrt(jnp.float32(hidden_size))
    weights = jax.random.uniform(
        kw, (depth, hidden_size, hidden_size), jnp.float32, -bound, bound)
    biases = jax.random.uniform(
        kb, (depth, hidden_size), jnp.float32, -bound, bound)

    x = jax.random.normal(kx, (batch, seq, hidden_size), jnp.float32)
    x2d = x.reshape(batch * seq, hidden_size)

    # f32 MXU operands: exact check, both resident (auto) and streamed paths.
    w_f32, b_f32 = prepare_mlp_params(weights, biases, compute_dtype=jnp.float32)
    ref_f32 = _ref_mlp_block(x2d, weights, biases)
    out_f32 = jax.block_until_ready(mlp_block(x2d, w_f32, b_f32))
    assert out_f32.shape == (batch * seq, hidden_size)
    assert jnp.allclose(out_f32, ref_f32, atol=1e-5, rtol=1e-5), "f32 resident mismatch"
    out_f32_s = jax.block_until_ready(
        mlp_block(x2d, w_f32, b_f32, layers_resident=False))
    assert jnp.allclose(out_f32_s, ref_f32, atol=1e-5, rtol=1e-5), "f32 streamed mismatch"

    # bf16 MXU operands (DEFAULT; f32 accumulate + f32 carry), both paths.
    w_bf16, b_bf16 = prepare_mlp_params(weights, biases)   # bf16 default
    ref_bf16 = _ref_mlp_block(x2d, weights, biases, compute_dtype=jnp.bfloat16)
    out_bf16 = jax.block_until_ready(mlp_block(x2d, w_bf16, b_bf16))
    assert jnp.allclose(out_bf16, ref_bf16, atol=3e-2, rtol=3e-2), "bf16 resident mismatch"
    out_bf16_s = jax.block_until_ready(
        mlp_block(x2d, w_bf16, b_bf16, layers_resident=False))
    assert jnp.allclose(out_bf16_s, ref_bf16, atol=3e-2, rtol=3e-2), "bf16 streamed mismatch"

    # Restore the original [batch, seq, hidden] view (pure glue).
    _ = out_bf16.reshape(batch, seq, hidden_size)

    print("KERNEL_OK")
</pallas_src>

<mosaic_0001>
module attributes {stable_mosaic.version = 11 : i64} {
  func.func @_mlp_resident_kernel(%arg0: i32, %arg1: memref<8x128xf32, #tpu.memory_space<vmem>>, %arg2: memref<3x128x128xf32, #tpu.memory_space<vmem>>, %arg3: memref<3x1x128xf32, #tpu.memory_space<vmem>>, %arg4: memref<8x128xf32, #tpu.memory_space<vmem>>) attributes {dimension_semantics = [#tpu.dimension_semantics<parallel>], iteration_bounds = array<i64: 2>, scalar_prefetch = 0 : i64, scratch_operands = 0 : i64, tpu.core_type = #tpu.core_type<tc>, window_params = [{transform_indices = @transform_0, window_bounds = array<i64: 8, 128>}, {pipeline_mode = #tpu.pipeline_mode<synchronous>, transform_indices = @transform_1, window_bounds = array<i64: 3, 128, 128>}, {pipeline_mode = #tpu.pipeline_mode<synchronous>, transform_indices = @transform_2, window_bounds = array<i64: 3, 1, 128>}, {transform_indices = @transform_3, window_bounds = array<i64: 8, 128>}]} {
    %c0 = arith.constant 0 : index
    %c0_0 = arith.constant 0 : index
    %0 = vector.load %arg1[%c0, %c0_0] : memref<8x128xf32, #tpu.memory_space<vmem>>, vector<8x128xf32>
    %c0_i32 = arith.constant 0 : i32
    %1 = arith.index_cast %c0_i32 : i32 to index
    %c0_1 = arith.constant 0 : index
    %c0_2 = arith.constant 0 : index
    %2 = vector.load %arg2[%1, %c0_1, %c0_2] : memref<3x128x128xf32, #tpu.memory_space<vmem>>, vector<1x128x128xf32>
    %3 = vector.shape_cast %2 : vector<1x128x128xf32> to vector<128x128xf32>
    %cst = arith.constant dense<0.000000e+00> : vector<8x128xf32>
    %4 = tpu.matmul %0, %3, %cst {dimension_numbers = #tpu.dot_dimension_numbers<[1], [0], [0], [1], [0, 0, 1, 1], [], []>} : vector<8x128xf32>, vector<128x128xf32>, vector<8x128xf32> -> vector<8x128xf32>
    %5 = arith.index_cast %c0_i32 : i32 to index
    %c0_3 = arith.constant 0 : index
    %c0_4 = arith.constant 0 : index
    %6 = vector.load %arg3[%5, %c0_3, %c0_4] : memref<3x1x128xf32, #tpu.memory_space<vmem>>, vector<1x1x128xf32>
    %7 = vector.shape_cast %6 : vector<1x1x128xf32> to vector<1x128xf32>
    %8 = vector.broadcast %7 : vector<1x128xf32> to vector<8x128xf32>
    %9 = arith.addf %4, %8 : vector<8x128xf32>
    %cst_5 = arith.constant 0.000000e+00 : f32
    %10 = vector.broadcast %cst_5 : f32 to vector<8x128xf32>
    %11 = arith.maximumf %9, %10 : vector<8x128xf32>
    %c1_i32 = arith.constant 1 : i32
    %12 = arith.index_cast %c1_i32 : i32 to index
    %c0_6 = arith.constant 0 : index
    %c0_7 = arith.constant 0 : index
    %13 = vector.load %arg2[%12, %c0_6, %c0_7] : memref<3x128x128xf32, #tpu.memory_space<vmem>>, vector<1x128x128xf32>
    %14 = vector.shape_cast %13 : vector<1x128x128xf32> to vector<128x128xf32>
    %cst_8 = arith.constant dense<0.000000e+00> : vector<8x128xf32>
    %15 = tpu.matmul %11, %14, %cst_8 {dimension_numbers = #tpu.dot_dimension_numbers<[1], [0], [0], [1], [0, 0, 1, 1], [], []>} : vector<8x128xf32>, vector<128x128xf32>, vector<8x128xf32> -> vector<8x128xf32>
    %16 = arith.index_cast %c1_i32 : i32 to index
    %c0_9 = arith.constant 0 : index
    %c0_10 = arith.constant 0 : index
    %17 = vector.load %arg3[%16, %c0_9, %c0_10] : memref<3x1x128xf32, #tpu.memory_space<vmem>>, vector<1x1x128xf32>
    %18 = vector.shape_cast %17 : vector<1x1x128xf32> to vector<1x128xf32>
    %19 = vector.broadcast %18 : vector<1x128xf32> to vector<8x128xf32>
    %20 = arith.addf %15, %19 : vector<8x128xf32>
    %cst_11 = arith.constant 0.000000e+00 : f32
    %21 = vector.broadcast %cst_11 : f32 to vector<8x128xf32>
    %22 = arith.maximumf %20, %21 : vector<8x128xf32>
    %c2_i32 = arith.constant 2 : i32
    %23 = arith.index_cast %c2_i32 : i32 to index
    %c0_12 = arith.constant 0 : index
    %c0_13 = arith.constant 0 : index
    %24 = vector.load %arg2[%23, %c0_12, %c0_13] : memref<3x128x128xf32, #tpu.memory_space<vmem>>, vector<1x128x128xf32>
    %25 = vector.shape_cast %24 : vector<1x128x128xf32> to vector<128x128xf32>
    %cst_14 = arith.constant dense<0.000000e+00> : vector<8x128xf32>
    %26 = tpu.matmul %22, %25, %cst_14 {dimension_numbers = #tpu.dot_dimension_numbers<[1], [0], [0], [1], [0, 0, 1, 1], [], []>} : vector<8x128xf32>, vector<128x128xf32>, vector<8x128xf32> -> vector<8x128xf32>
    %27 = arith.index_cast %c2_i32 : i32 to index
    %c0_15 = arith.constant 0 : index
    %c0_16 = arith.constant 0 : index
    %28 = vector.load %arg3[%27, %c0_15, %c0_16] : memref<3x1x128xf32, #tpu.memory_space<vmem>>, vector<1x1x128xf32>
    %29 = vector.shape_cast %28 : vector<1x1x128xf32> to vector<1x128xf32>
    %30 = vector.broadcast %29 : vector<1x128xf32> to vector<8x128xf32>
    %31 = arith.addf %26, %30 : vector<8x128xf32>
    %cst_17 = arith.constant 0.000000e+00 : f32
    %32 = vector.broadcast %cst_17 : f32 to vector<8x128xf32>
    %33 = arith.maximumf %31, %32 : vector<8x128xf32>
    %c3_i32 = arith.constant 3 : i32
    %c0_18 = arith.constant 0 : index
    %c0_19 = arith.constant 0 : index
    %34 = vector.load %arg4[%c0_18, %c0_19] : memref<8x128xf32, #tpu.memory_space<vmem>>, vector<8x128xf32>
    tpu.vector_store %arg4[%c0_18, %c0_19], %33 {strides = array<i32>} : memref<8x128xf32, #tpu.memory_space<vmem>>, vector<8x128xf32>,
    return
  }
  func.func @transform_0(%arg0: i32) -> (i32, i32) {
    %c0_i32 = arith.constant 0 : i32
    %c0_i32_0 = arith.constant 0 : i32
    return %arg0, %c0_i32 : i32, i32
  }
  func.func @transform_1(%arg0: i32) -> (i32, i32, i32) {
    %c0_i32 = arith.constant 0 : i32
    %c0_i32_0 = arith.constant 0 : i32
    %c0_i32_1 = arith.constant 0 : i32
    %c0_i32_2 = arith.constant 0 : i32
    return %c0_i32, %c0_i32_0, %c0_i32_1 : i32, i32, i32
  }
  func.func @transform_2(%arg0: i32) -> (i32, i32, i32) {
    %c0_i32 = arith.constant 0 : i32
    %c0_i32_0 = arith.constant 0 : i32
    %c0_i32_1 = arith.constant 0 : i32
    %c0_i32_2 = arith.constant 0 : i32
    return %c0_i32, %c0_i32_0, %c0_i32_1 : i32, i32, i32
  }
  func.func @transform_3(%arg0: i32) -> (i32, i32) {
    %c0_i32 = arith.constant 0 : i32
    %c0_i32_0 = arith.constant 0 : i32
    return %arg0, %c0_i32 : i32, i32
  }
}

</mosaic_0001>

<bundles_post_ra>
// kernel: tpu_custom_call.1
= control target key start
LH: loop header
LB: loop body
LE: loop exit
PB: predicated region body
PF: predicated region fallthrough
CT: control target
= control target key end

     0   :  { %8 = vsyncpa [#allocation3], 0  ;;  %s1194_s0 = inlined_call_operand.hbm [shape: f32[16,128], index: 0, kind: input, shape index: {}, may-alias: {0,3}]   ;;  %s1195_s1 = inlined_call_operand.hbm [shape: f32[3,128,128], index: 1, kind: input, shape index: {}]   ;;  %s1196_s2 = inlined_call_operand.vmem [shape: f32[3,1,128], index: 2, kind: input, shape index: {}]   ;;  %s1197_s3 = inlined_call_operand.hbm [shape: f32[16,128], index: 3, kind: output, shape index: {}, may-alias: {0,3}]  }
   0x1   :  { %10 = vsyncpa [#allocation3 + $0x1], 0 }
   0x2   :  { %11 = vsyncpa [#allocation6], 0 }
   0x3   :  { %12 = vsyncpa [#allocation4], 0 }
   0x4   :  { %14 = vsyncpa [#allocation4 + $0x1], 0  ;;  %s970_s12 = smov 0   ;;  %s972_s13 = smov 0  }
   0x5   :  { %s974_s14 = smov 0   ;;  %s976_s15 = smov 0  }
   0x6 LB: > { %s991_s16 = sadd.s32 4294967295, %s941_s15   ;;  %s583_s17 = sadd.s32 4294967294, %s941_s15   ;;  %s941_s15 = sphi %s976_s15, %s1219_s15   ;;  %s937_s14 = sphi %s974_s14, %s1218_s14   ;;  %s933_s13 = sphi %s972_s13, %s1217_s13   ;;  %s929_s12 = sphi %s970_s12, %s1216_s12  }
   0x7   : > { %p40_p0 = scmp.ne.s32.totalorder %s933_s13, %s929_s12  ;;  %p1198_p1 = scmp.eq.s32.totalorder %s991_s16, 0 }
   0x8   : > { %p112_p3 = scmp.eq.s32.totalorder %s583_s17, 1  ;;  %p584_p5 = scmp.ge.s32.totalorder %s941_s15, 1 }
   0x9   : > { %p1000_p4 = por %p1198_p1, %p40_p0  ;;  %p119_p7 = scmp.lt.s32.totalorder %s941_s15, 3 }
   0xa   : > { %p1005_p6 = por %p112_p3, %p40_p0  ;;  %s943_s21 = smov [#allocation5]  }
   0xb   : > { %s1202_s18 = scalar_select %p1000_p4, 1, 0 }
   0xc   : > { %s1203_s19 = scalar_select %p1005_p6, 1, 0 }
   0xd   : > { %p1010_p8 = pnand %p584_p5, %p119_p7  ;;  %s131_s22 = sshll.u32 %s943_s21, 4  ;;  %s132_s22 = int_to_ptr.vmem [resolvable:$true] %s131_s22 }
   0xe   : > { %s1024_s24 = sadd.s32 1, %s941_s15   ;;  %s27_s25 = sadd.s32 1, %s937_s14 }
   0xf   : > { %s1204_s20 = scalar_select %p1010_p8, 1, 0 }
  0x10   : > { %p766_p9 = pneg %p1010_p8  ;;  %s24_s26 = ssub.s32 %s941_s15, %s1024_s24 }
  0x11   : > { %s830_s27 = scalar_lea.vmem %s132_s22, 6144  ;;  %p838_p5 = scmp.lt.s32.totalorder %s132_s22, %s132_s22 }
  0x12   : > { %p1019_p11 = pnand %p766_p9, %p1198_p1  ;;  %p831_p13 = scmp.ne.s32.totalorder %s132_s22, %s830_s27 }
  0x13   : > { %p839_p7 = scmp.lt.s32.totalorder %s830_s27, %s830_s27 }
  0x14   : > { %p821_p12 = pneg %p1019_p11 }
  0x15   : > { %p840_p10 = por %p839_p7, %p838_p5 }
  0x16   : > { %p833_p0 = pnand %p831_p13, %p821_p12 }
  0x18   : > { %p834_p3 = pneg %p833_p0 }
  0x1a   : > { %p841_p2 = pnand %p840_p10, %p834_p3 }
  0x1c   : > { %844 = shalt.err (!%p841_p2)
}
  0x1d   : > { %s944_s28 = smov 128   ;;  %s945_s29 = smov 8  }
  0x1e   : > { %769 = dma.hbm_to_vmem [thread:$0]  (!%p1019_p11), %s1195_s1, 6144, %s132_s22, [#allocation6], %s944_s28, %s944_s28, %s945_s29  }
  0x1f   : > { %p25_p9 = scmp.eq.s32.totalorder %s24_s26, 0  ;;  %p34_p12 = scmp.ne.s32.totalorder %s937_s14, %s933_s13 }
  0x20   : > { %p35_p10 = scmp.eq.s32.totalorder %s941_s15, 0  ;;  %p779_p2 = scmp.lt.s32.totalorder %s941_s15, 2 }
  0x21   : > { %s1041_s5 = scalar_select %p25_p9, %s937_s14, %s27_s25  }
  0x22   : > { %p36_p13 = por %p35_p10, %p34_p12  ;;  %p1206_p0 = scmp.eq.s32.totalorder %s991_s16, 1 }
  0x23   : > { %s148_s7 = sand.u32 1, %s937_s14   ;;  %s588_s8 = sshll.u32 %s941_s15, 7 }
  0x24   : > { %p1045_p3 = por %p1206_p0, %p34_p12  ;;  %s587_s9 = sshll.u32 %s148_s7, 3 }
  0x25   : > { %s1054_s17 = scalar_lea.hbm %s1194_s0, %s588_s8  ;;  %s152_s21 = scalar_lea.vmem [#allocation2], %s587_s9 }
  0x26   : > { %s1207_s6 = scalar_select %p1045_p3, 1, 0 }
  0x27   : > { %s159_s22 = sshll.u32 %s152_s21, 4  ;;  %p1056_p11 = pnand %p779_p2, %p36_p13  ;;  %s160_s22 = int_to_ptr.vmem [resolvable:$true] %s159_s22 }
  0x28   : > { %s149_s25 = scalar_lea.sflag [#allocation3], %s148_s7  ;;  %s845_s26 = scalar_lea.hbm %s1054_s17, 128 }
  0x29   : > { %p846_p5 = scmp.ne.s32.totalorder %s1054_s17, %s845_s26  ;;  %p847_p7 = pneg %p1056_p11 }
  0x2a   : > { %s850_s29 = scalar_lea.hbm %s1194_s0, 256  ;;  %p851_p10 = scmp.lt.s32.totalorder %s1054_s17, %s1194_s0 }
  0x2b   : > { %p848_p9 = pnand %p847_p7, %p846_p5  ;;  %p852_p2 = scmp.lt.s32.totalorder %s850_s29, %s845_s26 }
  0x2d   : > { %p849_p12 = pneg %p848_p9  ;;  %p853_p13 = por %p852_p2, %p851_p10 }
  0x2f   : > { %p854_p0 = pnand %p853_p13, %p849_p12 }
  0x31   : > { %857 = shalt.err (!%p854_p0)
}
  0x32   : > { %s858_s8 = scalar_lea.vmem %s160_s22, 128  ;;  %s946_s7 = smov [#allocation2]  }
  0x33   : > { %p859_p1 = scmp.ne.s32.totalorder %s160_s22, %s858_s8  ;;  %s863_s9 = sshll.u32 %s946_s7, 4  ;;  %s864_s9 = int_to_ptr.vmem [resolvable:$false] %s863_s9 }
  0x34   : > { %s865_s10 = scalar_lea.vmem %s864_s9, 256  ;;  %p866_p5 = scmp.lt.s32.totalorder %s160_s22, %s864_s9 }
  0x35   : > { %p861_p6 = pnand %p859_p1, %p847_p7  ;;  %p867_p9 = scmp.lt.s32.totalorder %s865_s10, %s858_s8 }
  0x37   : > { %p862_p3 = pneg %p861_p6  ;;  %p868_p4 = por %p867_p9, %p866_p5 }
  0x39   : > { %p869_p8 = pnand %p868_p4, %p862_p3 }
  0x3b   : > { %872 = shalt.err (!%p869_p8)
}
  0x3c   : > { %773 = dma.hbm_to_vmem [thread:$0]  (!%p1056_p11), %s1054_s17, 128, %s160_s22, %s149_s25  }
  0x3d   : > { %p1209_p12 = scmp.ne.s32.totalorder %s1204_s20, 0 }
  0x3e   : > { %s1077_s11 = sand.u32 (!%p1209_p12), 1, %s933_s13   ;;  %p1210_p1 = scmp.ne.s32.totalorder (!%p1209_p12), %s1202_s18, 0 }
  0x3f   : > { %168 = sbr.rel (%p1209_p12) target bundleno = 710 (0x2c6), region = 32  ;;  %s590_s21 = sshll.u32 (!%p1209_p12), %s1077_s11, 3 }
  0x40   : > { %s171_s26 = scalar_lea.sflag (!%p1209_p12), [#allocation3], %s1077_s11  ;;  %s1083_s27 = scalar_lea.vmem (!%p1209_p12), [#allocation2], %s590_s21 }
  0x44   : > { %916 = dma.done.wait (%p1210_p1), %s171_s26, 128  }
  0x45   : > { %918 = vsyncadd (%p1210_p1), %s171_s26, 4294967168  ;;  %p1211_p4 = scmp.eq.s32.totalorder %s991_s16, 0 }
  0x47   : > { %920 = dma.done.wait (%p1211_p4), [#allocation6], 6144   ;;  %p1212_p6 = pmov %p1211_p4 }
  0x48   : > { %v947_v0 = vmov 0.0   ;;  %vm948_vm0 = vmmov 0   ;;  %v217_v1 = vld [vmem:[#allocation5 + $0x78] sm:$0xff]  ;;  %v216_v2 = vld [vmem:[#allocation5 + $0x70] sm:$0xff]  ;;  %v215_v3 = vld [vmem:[#allocation5 + $0x68] sm:$0xff]  ;;  %s599_s28 = sshll.u32 %s991_s16, 7 }
  0x49   : > { %922 = vsyncadd (%p1212_p6), [#allocation6], 4294961152  ;;  %653 = vmatprep.subr.mxu0 %v947_v0  ;;  %685 = vmatprep.mubr.msk.f32.mxu0 %vm948_vm0, %v947_v0  ;;  %v214_v4 = vld [vmem:[#allocation5 + $0x60] sm:$0xff]  ;;  %v312_v5 = vld [vmem:[#allocation5 + $0xf8] sm:$0xff]  ;;  %s200_s29 = scalar_lea.vmem [#allocation7], %s590_s21  ;;  %s501_s7 = scalar_lea.hbm %s1197_s3, %s599_s28 }
  0x4a   : > { %688 = vmatprep.subr.mxu1 %v947_v0  ;;  %720 = vmatprep.mubr.msk.f32.mxu1 %vm948_vm0, %v947_v0  ;;  %v213_v6 = vld [vmem:[#allocation5 + $0x58] sm:$0xff]  ;;  %v311_v7 = vld [vmem:[#allocation5 + $0xf0] sm:$0xff]  ;;  %v310_v8 = vld [vmem:[#allocation5 + $0xe8] sm:$0xff]  ;;  %s503_s30 = sshll.u32 %s200_s29, 4  ;;  %s490_s9 = scalar_lea.sflag [#allocation4], %s1077_s11  ;;  %s504_s30 = int_to_ptr.vmem [resolvable:$true] %s503_s30 }
  0x4b   : > { %654 = vmatpush3.msra.mxu0 %v217_v1  ;;  %689 = vmatpush3.msra.mxu1 %v312_v5  ;;  %v212_v9 = vld [vmem:[#allocation5 + $0x50] sm:$0xff]  ;;  %v309_v10 = vld [vmem:[#allocation5 + $0xe0] sm:$0xff]  ;;  %v211_v11 = vld [vmem:[#allocation5 + $0x48] sm:$0xff]  ;;  %s873_s10 = scalar_lea.vmem %s504_s30, 128  ;;  %p1213_p3 = scmp.ne.s32.totalorder %s1207_s6, 0 }
  0x4c   : > { %655 = vmatprep.subr.mxu0 %v947_v0  ;;  %690 = vmatprep.subr.mxu1 %v947_v0  ;;  %v308_v12 = vld [vmem:[#allocation5 + $0xd8] sm:$0xff]  ;;  %v210_v13 = vld [vmem:[#allocation5 + $0x40] sm:$0xff]  ;;  %v307_v14 = vld [vmem:[#allocation5 + $0xd0] sm:$0xff]  ;;  %p874_p8 = scmp.ne.s32.totalorder %s504_s30, %s873_s10  ;;  %s949_s26 = smov [#allocation7]  }
  0x4d   : > { %656 = vmatpush3.msra.mxu0 %v216_v2  ;;  %691 = vmatpush3.msra.mxu1 %v311_v7  ;;  %v209_v15 = vld [vmem:[#allocation5 + $0x38] sm:$0xff]  ;;  %v306_v16 = vld [vmem:[#allocation5 + $0xc8] sm:$0xff]  ;;  %v208_v17 = vld [vmem:[#allocation5 + $0x30] sm:$0xff]  ;;  %s877_s16 = sshll.u32 %s949_s26, 4  ;;  %s878_s16 = int_to_ptr.vmem [resolvable:$false] %s877_s16 }
  0x4e   : > { %657 = vmatprep.subr.mxu0 %v947_v0  ;;  %692 = vmatprep.subr.mxu1 %v947_v0  ;;  %v305_v18 = vld [vmem:[#allocation5 + $0xc0] sm:$0xff]  ;;  %v207_v19 = vld [vmem:[#allocation5 + $0x28] sm:$0xff]  ;;  %v304_v20 = vld [vmem:[#allocation5 + $0xb8] sm:$0xff]  ;;  %p875_p11 = pnand %p874_p8, %p1213_p3  ;;  %s879_s21 = scalar_lea.vmem %s878_s16, 256 }
  0x4f   : > { %658 = vmatpush3.msra.mxu0 %v215_v3  ;;  %693 = vmatpush3.msra.mxu1 %v310_v8  ;;  %v206_v21 = vld [vmem:[#allocation5 + $0x20] sm:$0xff]  ;;  %v303_v22 = vld [vmem:[#allocation5 + $0xb0] sm:$0xff]  ;;  %v205_v23 = vld [vmem:[#allocation5 + $0x18] sm:$0xff]  ;;  %p880_p10 = scmp.lt.s32.totalorder %s504_s30, %s878_s16  ;;  %p881_p2 = scmp.lt.s32.totalorder %s879_s21, %s873_s10 }
  0x50   : > { %659 = vmatprep.subr.mxu0 %v947_v0  ;;  %694 = vmatprep.subr.mxu1 %v947_v0  ;;  %v302_v24 = vld [vmem:[#allocation5 + $0xa8] sm:$0xff]  ;;  %v204_v25 = vld [vmem:[#allocation5 + $0x10] sm:$0xff]  ;;  %v301_v26 = vld [vmem:[#allocation5 + $0xa0] sm:$0xff]  ;;  %p876_p7 = pneg %p875_p11 }
  0x51   : > { %660 = vmatpush3.msra.mxu0 %v214_v4  ;;  %695 = vmatpush3.msra.mxu1 %v309_v10  ;;  %v203_v27 = vld [vmem:[#allocation5 + $0x8] sm:$0xff]  ;;  %v300_v28 = vld [vmem:[#allocation5 + $0x98] sm:$0xff]  ;;  %v202_v29 = vld [vmem:[#allocation5] sm:$0xff]  ;;  %p882_p13 = por %p881_p2, %p880_p10 }
  0x52   : > { %661 = vmatprep.subr.mxu0 %v947_v0  ;;  %696 = vmatprep.subr.mxu1 %v947_v0  ;;  %v201_v30 = vld [vmem:[%s1083_s27] sm:$0xff]  ;;  %v298_v32 = vld [vmem:[#allocation5 + $0x88] sm:$0xff]  ;;  %v297_v33 = vld [vmem:[#allocation5 + $0x80] sm:$0xff] }
  0x53   : > { %662 = vmatpush3.msra.mxu0 %v213_v6  ;;  %697 = vmatpush3.msra.mxu1 %v308_v12  ;;  %v299_v31 = vld [vmem:[#allocation5 + $0x90] sm:$0xff]  ;;  %v408_v34 = vld [vmem:[#allocation5 + $0x178] sm:$0xff]  ;;  %v406_v36 = vld [vmem:[#allocation5 + $0x168] sm:$0xff]  ;;  %p883_p0 = pnand %p882_p13, %p876_p7 }
  0x54   : > { %663 = vmatprep.subr.mxu0 %v947_v0  ;;  %698 = vmatprep.subr.mxu1 %v947_v0  ;;  %v407_v35 = vld [vmem:[#allocation5 + $0x170] sm:$0xff]  ;;  %v405_v37 = vld [vmem:[#allocation5 + $0x160] sm:$0xff]  ;;  %v404_v38 = vld [vmem:[#allocation5 + $0x158] sm:$0xff] }
  0x55   : > { %664 = vmatpush3.msra.mxu0 %v212_v9  ;;  %699 = vmatpush3.msra.mxu1 %v307_v14  ;;  %v403_v39 = vld [vmem:[#allocation5 + $0x150] sm:$0xff]  ;;  %v402_v40 = vld [vmem:[#allocation5 + $0x148] sm:$0xff]  ;;  %v401_v41 = vld [vmem:[#allocation5 + $0x140] sm:$0xff] }
  0x56   : > { %665 = vmatprep.subr.mxu0 %v947_v0  ;;  %700 = vmatprep.subr.mxu1 %v947_v0  ;;  %v400_v42 = vld [vmem:[#allocation5 + $0x138] sm:$0xff]  ;;  %v399_v43 = vld [vmem:[#allocation5 + $0x130] sm:$0xff]  ;;  %v398_v44 = vld [vmem:[#allocation5 + $0x128] sm:$0xff] }
  0x57   : > { %666 = vmatpush3.msra.mxu0 %v211_v11  ;;  %701 = vmatpush3.msra.mxu1 %v306_v16  ;;  %v397_v45 = vld [vmem:[#allocation5 + $0x120] sm:$0xff]  ;;  %v396_v46 = vld [vmem:[#allocation5 + $0x118] sm:$0xff]  ;;  %v593_v47 = vld [vmem:[%s1196_s2] ss:$0 sm:$0xff] }
  0x58   : > { %667 = vmatprep.subr.mxu0 %v947_v0  ;;  %702 = vmatprep.subr.mxu1 %v947_v0  ;;  %v395_v52 = vld [vmem:[#allocation5 + $0x110] sm:$0xff]  ;;  %v394_v53 = vld [vmem:[#allocation5 + $0x108] sm:$0xff]  ;;  %v393_v54 = vld [vmem:[#allocation5 + $0x100] sm:$0xff] }
  0x59   : > { %668 = vmatpush3.msra.mxu0 %v210_v13  ;;  %703 = vmatpush3.msra.mxu1 %v305_v18  ;;  %v595_v55 = vld [vmem:[%s1196_s2 + $0x1] ss:$0 sm:$0xff]  ;;  %v597_v60 = vld [vmem:[%s1196_s2 + $0x2] ss:$0 sm:$0xff] }
  0x5a   : > { %669 = vmatprep.subr.mxu0 %v947_v0  ;;  %704 = vmatprep.subr.mxu1 %v947_v0 }
  0x5b   : > { %670 = vmatpush3.msra.mxu0 %v209_v15  ;;  %705 = vmatpush3.msra.mxu1 %v304_v20 }
  0x5c   : > { %671 = vmatprep.subr.mxu0 %v947_v0  ;;  %706 = vmatprep.subr.mxu1 %v947_v0 }
  0x5d   : > { %672 = vmatpush3.msra.mxu0 %v208_v17  ;;  %707 = vmatpush3.msra.mxu1 %v303_v22 }
  0x5e   : > { %673 = vmatprep.subr.mxu0 %v947_v0  ;;  %708 = vmatprep.subr.mxu1 %v947_v0 }
  0x5f   : > { %674 = vmatpush3.msra.mxu0 %v207_v19  ;;  %709 = vmatpush3.msra.mxu1 %v302_v24 }
  0x60   : > { %675 = vmatprep.subr.mxu0 %v947_v0  ;;  %710 = vmatprep.subr.mxu1 %v947_v0 }
  0x61   : > { %676 = vmatpush3.msra.mxu0 %v206_v21  ;;  %711 = vmatpush3.msra.mxu1 %v301_v26 }
  0x62   : > { %677 = vmatprep.subr.mxu0 %v947_v0  ;;  %712 = vmatprep.subr.mxu1 %v947_v0 }
  0x63   : > { %678 = vmatpush3.msra.mxu0 %v205_v23  ;;  %713 = vmatpush3.msra.mxu1 %v300_v28 }
  0x64   : > { %679 = vmatprep.subr.mxu0 %v947_v0  ;;  %714 = vmatprep.subr.mxu1 %v947_v0 }
  0x65   : > { %680 = vmatpush3.msra.mxu0 %v204_v25  ;;  %715 = vmatpush3.msra.mxu1 %v299_v31 }
  0x66   : > { %681 = vmatprep.subr.mxu0 %v947_v0  ;;  %716 = vmatprep.subr.mxu1 %v947_v0 }
  0x67   : > { %682 = vmatpush3.msra.mxu0 %v203_v27  ;;  %717 = vmatpush3.msra.mxu1 %v298_v32 }
  0x68   : > { %683 = vmatprep.subr.mxu0 %v947_v0  ;;  %718 = vmatprep.subr.mxu1 %v947_v0 }
  0x69   : > { %684 = vmatpush3.msra.mxu0 %v202_v29  ;;  %719 = vmatpush3.msra.mxu1 %v297_v33 }
  0x6a   : > { %686 = vmatmul.mubr.f32.vlgmr.msra.gmra.mxu0 %v201_v30  ;;  %723 = vmatprep.subr.mxu0 %v947_v0 }
  0x6b   : > { %755 = vmatprep.mubr.msk.f32.mxu0 %vm948_vm0, %v947_v0  ;;  %724 = vmatpush3.msra.mxu0 %v408_v34 }
  0x6c   : > { %725 = vmatprep.subr.mxu0 %v947_v0 }
  0x6d   : > { %726 = vmatpush3.msra.mxu0 %v407_v35 }
  0x6e   : > { %727 = vmatprep.subr.mxu0 %v947_v0 }
  0x6f   : > { %728 = vmatpush3.msra.mxu0 %v406_v36 }
  0x70   : > { %729 = vmatprep.subr.mxu0 %v947_v0 }
  0x71   : > { %730 = vmatpush3.msra.mxu0 %v405_v37 }
  0x72   : > { %731 = vmatprep.subr.mxu0 %v947_v0 }
  0x73   : > { %732 = vmatpush3.msra.mxu0 %v404_v38 }
  0x74   : > { %733 = vmatprep.subr.mxu0 %v947_v0 }
  0x75   : > { %734 = vmatpush3.msra.mxu0 %v403_v39 }
  0x76   : > { %735 = vmatprep.subr.mxu0 %v947_v0 }
  0x77   : > { %736 = vmatpush3.msra.mxu0 %v402_v40 }
  0x78   : > { %737 = vmatprep.subr.mxu0 %v947_v0 }
  0x79   : > { %738 = vmatpush3.msra.mxu0 %v401_v41 }
  0x7a   : > { %739 = vmatprep.subr.mxu0 %v947_v0 }
  0x7b   : > { %740 = vmatpush3.msra.mxu0 %v400_v42 }
  0x7c   : > { %741 = vmatprep.subr.mxu0 %v947_v0 }
  0x7d   : > { %742 = vmatpush3.msra.mxu0 %v399_v43 }
  0x7e   : > { %743 = vmatprep.subr.mxu0 %v947_v0 }
  0x7f   : > { %744 = vmatpush3.msra.mxu0 %v398_v44 }
  0x80   : > { %745 = vmatprep.subr.mxu0 %v947_v0 }
  0x81   : > { %746 = vmatpush3.msra.mxu0 %v397_v45 }
  0x82   : > { %747 = vmatprep.subr.mxu0 %v947_v0 }
  0x83   : > { %748 = vmatpush3.msra.mxu0 %v396_v46 }
  0x84   : > { %749 = vmatprep.subr.mxu0 %v947_v0 }
  0x85   : > { %750 = vmatpush3.msra.mxu0 %v395_v52 }
  0x86   : > { %751 = vmatprep.subr.mxu0 %v947_v0 }
  0x87   : > { %752 = vmatpush3.msra.mxu0 %v394_v53 }
  0x88   : > { %753 = vmatprep.subr.mxu0 %v947_v0 }
  0x89   : > { %754 = vmatpush3.msra.mxu0 %v393_v54 }
 0x12a   : > { %v291_v48 = vpop.f32.mrf.mxu0 }
 0x12b   : > { %v292_v49 = vadd.f32 %v593_v47, %v291_v48 }
 0x12c   : > { %v687_v50 = vpop.f32.mrf.mxu0 }
 0x12d   : > { %v295_v51 = vmax.f32 %v292_v49, 0.0 }
 0x12f   : > { %721 = vmatmul.mubr.f32.vlgmr.msra.gmra.mxu1 %v295_v51 }
 0x1ef   : > { %v387_v56 = vpop.f32.mrf.mxu1 }
 0x1f0   : > { %v388_v57 = vadd.f32 %v595_v55, %v387_v56 }
 0x1f1   : > { %v722_v58 = vpop.f32.mrf.mxu1 }
 0x1f2   : > { %v391_v59 = vmax.f32 %v388_v57, 0.0 }
 0x1f4   : > { %756 = vmatmul.mubr.f32.vlgmr.msra.gmra.mxu0 %v391_v59 }
 0x2b4   : > { %v483_v61 = vpop.f32.mrf.mxu0 }
 0x2b5   : > { %v484_v62 = vadd.f32 %v597_v60, %v483_v61 }
 0x2b6   : > { %v757_v63 = vpop.f32.mrf.mxu0 }
 0x2b7   : > { %v487_v0 = vmax.f32 %v484_v62, 0.0 }
 0x2b9   : > { %488 = vst [vmem:[%s200_s29] sm:$0xff] %v487_v0 }
 0x2ba   : > { %886 = shalt.err (!%p883_p0)
}
 0x2bb   : > { %s887_s27 = scalar_lea.hbm %s501_s7, 128  ;;  %s891_s20 = scalar_lea.hbm %s1197_s3, 256 }
 0x2bc   : > { %p888_p5 = scmp.ne.s32.totalorder %s501_s7, %s887_s27  ;;  %p892_p1 = scmp.lt.s32.totalorder %s501_s7, %s1197_s3 }
 0x2bd   : > { %p893_p4 = scmp.lt.s32.totalorder %s891_s20, %s887_s27 }
 0x2be   : > { %p889_p9 = pnand %p888_p5, %p1213_p3 }
 0x2bf   : > { %p894_p6 = por %p893_p4, %p892_p1 }
 0x2c0   : > { %p890_p12 = pneg %p889_p9 }
 0x2c2   : > { %p895_p8 = pnand %p894_p6, %p890_p12 }
 0x2c4   : > { %898 = shalt.err (!%p895_p8)
}
 0x2c5   : > { %764 = dma.vmem_to_hbm [thread:$0]  (%p1213_p3), %s504_s30, 128, %s501_s7, %s490_s9  }
 0x2c6 PF: > { %s515_s23 = sand.u32 1, %s929_s12   ;;  %p1214_p11 = scmp.ne.s32.totalorder %s1203_s19, 0 }
 0x2c7   : > { %p1215_p7 = scmp.ge.s32.totalorder %s941_s15, 2  ;;  %s516_s25 = scalar_lea.sflag [#allocation4], %s515_s23 }
 0x2c9   : > { %p775_p10 = pnand %p1215_p7, %p1214_p11 }
 0x2cb   : > { %p776_p2 = pneg %p775_p10 }
 0x2cd   : > { %924 = dma.done.wait (%p776_p2), %s516_s25, 128  }
 0x2ce   : > { %926 = vsyncadd (%p776_p2), %s516_s25, 4294967168  ;;  %p17_p13 = scmp.ge.s32.totalorder %s1024_s24, 4   ;;  %s1216_s12 = smov %s933_s13 }
 0x2cf   : > { %s1217_s13 = smov %s937_s14  ;;  %s1218_s14 = smov %s1041_s5 }
 0x2d0   : > { %s1219_s15 = smov %s1024_s24  ;;  %19 = sbr.rel (!%p17_p13) target bundleno = 6 (0x6), region = 85 }
 0x2d5   :  { %521 = vsyncpa [#allocation3], 1 }
 0x2d6   :  { %523 = vsyncpa [#allocation3 + $0x1], 1 }
 0x2d7   :  { %524 = vsyncpa [#allocation6], 1 }
 0x2d8   :  { %525 = vsyncpa [#allocation4], 1 }
 0x2d9   :  { %527 = vsyncpa [#allocation4 + $0x1], 1 }

</bundles_post_ra>
